<compile_context>
chip_gen: v5e
topology: v5e:2x2
jax: 0.10.0
libtpu: 0.0.40
codegen_flags: <defaults>
</compile_context>

<pallas_src>
import functools

import jax
import jax.numpy as jnp
from jax.experimental import pallas as pl
from jax.experimental.pallas import tpu as pltpu


def _round_up(a, b):
    return ((a + b - 1) // b) * b


# ---------------------------------------------------------------------------
# Fused kernel: phase 0 = segment stats, phase 1 = projection + readout
# ---------------------------------------------------------------------------
def _fused_readout_kernel(b_row_ref, b_col_ref, x_ref, w_ref, out_ref,
                          sum_scr, cnt_scr, tgt_scr, *, mm_dtype):
    phase = pl.program_id(0)          # 0: segment sums/counts, 1: readout
    i = pl.program_id(1)              # node-tile index
    b_pad, _ = out_ref.shape

    @pl.when((phase == 0) & (i == 0))
    def _init():
        sum_scr[...] = jnp.zeros_like(sum_scr)
        cnt_scr[...] = jnp.zeros_like(cnt_scr)
        out_ref[...] = jnp.zeros_like(out_ref)

    # One-hot (graph x node) mask for this tile, from a skinny broadcast iota.
    b_row = b_row_ref[...]                                         # [1, tn] i32
    gid_col = jax.lax.broadcasted_iota(jnp.int32, (b_pad, 1), 0)   # [b_pad, 1]
    mask_bn = gid_col == b_row                                     # [b_pad, tn] bool
    m_bn = mask_bn.astype(mm_dtype)                                # exact 0/1
    x_mm = x_ref[...].astype(mm_dtype)                             # cast once per tile

    @pl.when(phase == 0)
    def _segment_stats():
        # Per-graph feature sums (MXU, f32 accumulate) + node counts (lane reduce).
        sum_scr[...] += jnp.dot(m_bn, x_mm, preferred_element_type=jnp.float32)
        cnt_scr[...] += jnp.sum(jnp.where(mask_bn, 1.0, 0.0),
                                axis=1, keepdims=True)             # [b_pad, 1] f32

    @pl.when(phase == 1)
    def _readout():
        @pl.when(i == 0)
        def _project():
            mean_pool = sum_scr[...] / jnp.maximum(cnt_scr[...], 1.0)
            tg = jnp.tanh(jnp.dot(mean_pool, w_ref[...],
                                  preferred_element_type=jnp.float32))
            tgt_scr[...] = jnp.transpose(tg)                       # [h, b_pad]

        # coefs[n] = sigmoid(<x[n], tg[batch[n]]>) via a lane-masked row-reduce
        # of x @ tg^T (contraction over h -- MXU-friendly; no gather).
        scores = jnp.dot(x_mm, tgt_scr[...].astype(mm_dtype),
                         preferred_element_type=jnp.float32)       # [tn, b_pad]
        b_col = b_col_ref[...]                                     # [tn, 1] i32
        gid_row = jax.lax.broadcasted_iota(jnp.int32, (1, b_pad), 1)
        logit = jnp.sum(jnp.where(gid_row == b_col, scores, 0.0),
                        axis=1, keepdims=True)                     # [tn, 1]
        coefs = jax.nn.sigmoid(logit)                              # f32 (VPU/EUP)
        weighted = x_mm * coefs.astype(mm_dtype)                   # [tn, h]

        # global_add_pool of the weighted node features, accumulated in-place
        # into the resident f32 output block.
        out_ref[...] += jnp.dot(m_bn, weighted,
                                preferred_element_type=jnp.float32)


# ---------------------------------------------------------------------------
# Host wrapper
# ---------------------------------------------------------------------------
def readout_pallas(x, batch, weight, num_graphs, *,
                   node_tile=2048, matmul_dtype=jnp.bfloat16):
    """x: [N, H], batch: [N] int, weight: [H, H] -> [num_graphs, H]."""
    n, h = x.shape
    f32 = jnp.float32

    b_pad = max(_round_up(num_graphs, 8), 8)
    tn = min(_round_up(node_tile, 128), _round_up(n, 128))
    n_pad = _round_up(n, tn)
    n_tiles = n_pad // tn

    # Store x at matmul precision when it is narrower than x's dtype:
    # halves the dominant HBM stream; precision is already bounded by the
    # matmul operand dtype, so the incremental cost is negligible.
    mm_dt = jnp.dtype(matmul_dtype)
    store_dtype = mm_dt if mm_dt.itemsize < jnp.dtype(x.dtype).itemsize else x.dtype

    if n_pad != n:
        x_p = jnp.zeros((n_pad, h), store_dtype).at[:n].set(x.astype(store_dtype))
        batch_p = jnp.full((n_pad,), -1, jnp.int32).at[:n].set(batch.astype(jnp.int32))
    else:
        x_p = x.astype(store_dtype)            # no-op when dtypes match
        batch_p = batch.astype(jnp.int32)

    b_row = batch_p.reshape(1, n_pad)          # graph ids on lanes
    b_col = batch_p.reshape(n_pad, 1)          # graph ids on sublanes
    w_f32 = weight.astype(f32)

    out_pad = pl.pallas_call(
        functools.partial(_fused_readout_kernel, mm_dtype=matmul_dtype),
        out_shape=jax.ShapeDtypeStruct((b_pad, h), f32),
        grid_spec=pltpu.PrefetchScalarGridSpec(
            num_scalar_prefetch=0,
            grid=(2, n_tiles),                                       # (phase, tile)
            in_specs=[
                pl.BlockSpec((1, tn), lambda p, i: (0, i)),          # batch (row view)
                pl.BlockSpec((tn, 1), lambda p, i: (i, 0)),          # batch (col view)
                pl.BlockSpec((tn, h), lambda p, i: (i, 0)),          # x tile (full h)
                pl.BlockSpec((h, h), lambda p, i: (0, 0)),           # W (resident)
            ],
            out_specs=pl.BlockSpec((b_pad, h), lambda p, i: (0, 0)), # resident acc
            scratch_shapes=[
                pltpu.VMEM((b_pad, h), f32),                         # segment sums
                pltpu.VMEM((b_pad, 1), f32),                         # node counts
                pltpu.VMEM((h, b_pad), f32),                         # tg^T
            ],
        ),
        compiler_params=pltpu.CompilerParams(
            dimension_semantics=("arbitrary", "arbitrary"),
            vmem_limit_bytes=48 * 1024 * 1024),
    )(b_row, b_col, x_p, w_f32)

    return out_pad[:num_graphs, :].astype(x.dtype)


def readout_reference(x, batch, weight, num_graphs):
    """Pure-JAX reference mirroring the PyTorch forward."""
    sums = jax.ops.segment_sum(x, batch, num_segments=num_graphs)
    counts = jax.ops.segment_sum(jnp.ones((x.shape[0],), x.dtype), batch,
                                 num_segments=num_graphs)
    mean_pool = sums / jnp.maximum(counts, 1.0)[:, None]
    tg = jnp.tanh(mean_pool @ weight)
    coefs = jax.nn.sigmoid(jnp.sum(x * tg[batch], axis=1))
    weighted = coefs[:, None] * x
    return jax.ops.segment_sum(weighted, batch, num_segments=num_graphs)


if __name__ == "__main__":
    key = jax.random.PRNGKey(0)
    hdim = 32
    kx, kw, kb = jax.random.split(key, 3)

    # xavier_uniform_ for (hdim, hdim): U(-a, a), a = sqrt(6 / (fan_in + fan_out))
    bound = (6.0 / (hdim + hdim)) ** 0.5
    weight = jax.random.uniform(kw, (hdim, hdim), dtype=jnp.float32,
                                minval=-bound, maxval=bound)

    # --- small case matching the module's intended use (B=2 graphs, H=32) ---
    num_nodes, num_graphs = 8, 2
    x = jax.random.normal(kx, (num_nodes, hdim), dtype=jnp.float32)
    batch = jnp.array([0, 0, 0, 0, 1, 1, 1, 1], dtype=jnp.int32)
    ref = readout_reference(x, batch, weight, num_graphs)

    # f32 matmul operands: tight-ish check (tolerance covers MXU f32 passes).
    out_f32 = jax.block_until_ready(
        readout_pallas(x, batch, weight, num_graphs, matmul_dtype=jnp.float32))
    assert out_f32.shape == (num_graphs, hdim)
    assert jnp.allclose(out_f32, ref, atol=5e-2, rtol=1e-2), "f32 mismatch (small)"

    # Default path: bf16 matmul operands + bf16-stored x, f32 accumulation.
    out_bf16 = jax.block_until_ready(readout_pallas(x, batch, weight, num_graphs))
    assert jnp.allclose(out_bf16, ref, atol=0.5, rtol=0.1), "bf16 mismatch (small)"

    # --- multi-tile case: unsorted batch ids, node padding, one empty graph -
    n2, b2 = 600, 6
    x2 = jax.random.normal(kx, (n2, hdim), dtype=jnp.float32)
    batch2 = jax.random.randint(kb, (n2,), 0, 5, dtype=jnp.int32)   # graph 5 empty
    ref2 = readout_reference(x2, batch2, weight, b2)

    out2_f32 = jax.block_until_ready(
        readout_pallas(x2, batch2, weight, b2, node_tile=256,
                       matmul_dtype=jnp.float32))
    assert out2_f32.shape == (b2, hdim)
    assert jnp.allclose(out2_f32, ref2, atol=5e-2, rtol=1e-2), "f32 mismatch (tiled)"

    out2_bf16 = jax.block_until_ready(
        readout_pallas(x2, batch2, weight, b2, node_tile=256))
    assert jnp.allclose(out2_bf16, ref2, atol=0.5, rtol=0.1), "bf16 mismatch (tiled)"

    print("KERNEL_OK")
</pallas_src>

<mosaic_0001>
module attributes {stable_mosaic.version = 11 : i64} {
  func.func @_fused_readout_kernel(%arg0: i32, %arg1: i32, %arg2: memref<1x128xi32, #tpu.memory_space<vmem>>, %arg3: memref<128x1xi32, #tpu.memory_space<vmem>>, %arg4: memref<128x32xf32, #tpu.memory_space<vmem>>, %arg5: memref<32x32xf32, #tpu.memory_space<vmem>>, %arg6: memref<8x32xf32, #tpu.memory_space<vmem>>, %arg7: memref<8x32xf32, #tpu.memory_space<vmem>>, %arg8: memref<8x1xf32, #tpu.memory_space<vmem>>, %arg9: memref<32x8xf32, #tpu.memory_space<vmem>>) attributes {dimension_semantics = [#tpu.dimension_semantics<arbitrary>, #tpu.dimension_semantics<arbitrary>], iteration_bounds = array<i64: 2, 1>, scalar_prefetch = 0 : i64, scratch_operands = 3 : i64, tpu.core_type = #tpu.core_type<tc>, window_params = [{transform_indices = @transform_0, window_bounds = array<i64: 1, 128>}, {transform_indices = @transform_1, window_bounds = array<i64: 128, 1>}, {transform_indices = @transform_2, window_bounds = array<i64: 128, 32>}, {pipeline_mode = #tpu.pipeline_mode<synchronous>, transform_indices = @transform_3, window_bounds = array<i64: 32, 32>}, {pipeline_mode = #tpu.pipeline_mode<synchronous>, transform_indices = @transform_4, window_bounds = array<i64: 8, 32>}]} {
    %c0_i32 = arith.constant 0 : i32
    %0 = arith.cmpi eq, %arg0, %c0_i32 : i32
    %c0_i32_0 = arith.constant 0 : i32
    %1 = arith.cmpi eq, %arg1, %c0_i32_0 : i32
    %2 = arith.andi %0, %1 : i1
    %3 = arith.extui %2 : i1 to i32
    %c0_i32_1 = arith.constant 0 : i32
    %4 = arith.cmpi ne, %3, %c0_i32_1 : i32
    scf.if %4 {
      %cst = arith.constant 0.000000e+00 : f32
      %19 = vector.broadcast %cst : f32 to vector<8x32xf32>
      %c0_8 = arith.constant 0 : index
      %c0_9 = arith.constant 0 : index
      %20 = vector.load %arg7[%c0_8, %c0_9] : memref<8x32xf32, #tpu.memory_space<vmem>>, vector<8x32xf32>
      tpu.vector_store %arg7[%c0_8, %c0_9], %19 {strides = array<i32>} : memref<8x32xf32, #tpu.memory_space<vmem>>, vector<8x32xf32>,
      %cst_10 = arith.constant 0.000000e+00 : f32
      %21 = vector.broadcast %cst_10 : f32 to vector<8x1xf32>
      %c0_11 = arith.constant 0 : index
      %c0_12 = arith.constant 0 : index
      %22 = vector.load %arg8[%c0_11, %c0_12] : memref<8x1xf32, #tpu.memory_space<vmem>>, vector<8x1xf32>
      tpu.vector_store %arg8[%c0_11, %c0_12], %21 {strides = array<i32>} : memref<8x1xf32, #tpu.memory_space<vmem>>, vector<8x1xf32>,
      %cst_13 = arith.constant 0.000000e+00 : f32
      %23 = vector.broadcast %cst_13 : f32 to vector<8x32xf32>
      %c0_14 = arith.constant 0 : index
      %c0_15 = arith.constant 0 : index
      %24 = vector.load %arg6[%c0_14, %c0_15] : memref<8x32xf32, #tpu.memory_space<vmem>>, vector<8x32xf32>
      tpu.vector_store %arg6[%c0_14, %c0_15], %23 {strides = array<i32>} : memref<8x32xf32, #tpu.memory_space<vmem>>, vector<8x32xf32>,
    } else {
    }
    %c0 = arith.constant 0 : index
    %c0_2 = arith.constant 0 : index
    %5 = vector.load %arg2[%c0, %c0_2] : memref<1x128xi32, #tpu.memory_space<vmem>>, vector<1x128xi32>
    %6 = tpu.iota {dimensions = array<i32: 0>} : vector<8x1xi32>
    %7 = vector.broadcast %6 : vector<8x1xi32> to vector<8x128xi32>
    %8 = vector.broadcast %5 : vector<1x128xi32> to vector<8x128xi32>
    %9 = arith.cmpi eq, %7, %8 : vector<8x128xi32>
    %10 = arith.extui %9 : vector<8x128xi1> to vector<8x128xi32>
    %11 = arith.sitofp %10 : vector<8x128xi32> to vector<8x128xf32>
    %c0_3 = arith.constant 0 : index
    %c0_4 = arith.constant 0 : index
    %12 = vector.load %arg4[%c0_3, %c0_4] : memref<128x32xf32, #tpu.memory_space<vmem>>, vector<128x32xf32>
    %c0_i32_5 = arith.constant 0 : i32
    %13 = arith.cmpi eq, %arg0, %c0_i32_5 : i32
    %14 = arith.extui %13 : i1 to i32
    %c0_i32_6 = arith.constant 0 : i32
    %15 = arith.cmpi ne, %14, %c0_i32_6 : i32
    scf.if %15 {
      %c0_8 = arith.constant 0 : index
      %c0_9 = arith.constant 0 : index
      %19 = vector.load %arg7[%c0_8, %c0_9] : memref<8x32xf32, #tpu.memory_space<vmem>>, vector<8x32xf32>
      %cst = arith.constant dense<0.000000e+00> : vector<8x32xf32>
      %20 = tpu.matmul %11, %12, %cst {dimension_numbers = #tpu.dot_dimension_numbers<[1], [0], [0], [1], [0, 0, 1, 1], [], []>} : vector<8x128xf32>, vector<128x32xf32>, vector<8x32xf32> -> vector<8x32xf32>
      %21 = arith.addf %19, %20 : vector<8x32xf32>
      %c0_10 = arith.constant 0 : index
      %c0_11 = arith.constant 0 : index
      %22 = vector.load %arg7[%c0_10, %c0_11] : memref<8x32xf32, #tpu.memory_space<vmem>>, vector<8x32xf32>
      tpu.vector_store %arg7[%c0_10, %c0_11], %21 {strides = array<i32>} : memref<8x32xf32, #tpu.memory_space<vmem>>, vector<8x32xf32>,
      %c0_12 = arith.constant 0 : index
      %c0_13 = arith.constant 0 : index
      %23 = vector.load %arg8[%c0_12, %c0_13] : memref<8x1xf32, #tpu.memory_space<vmem>>, vector<8x1xf32>
      %cst_14 = arith.constant 1.000000e+00 : f32
      %cst_15 = arith.constant 0.000000e+00 : f32
      %24 = vector.broadcast %cst_14 : f32 to vector<8x128xf32>
      %25 = vector.broadcast %cst_15 : f32 to vector<8x128xf32>
      %26 = arith.select %9, %24, %25 : vector<8x128xi1>, vector<8x128xf32>
      %cst_16 = arith.constant dense<0.000000e+00> : vector<8xf32>
      %27 = vector.multi_reduction <add>, %26, %cst_16 [1] : vector<8x128xf32> to vector<8xf32>
      %28 = vector.shape_cast %27 : vector<8xf32> to vector<8x1xf32>
      %29 = arith.addf %23, %28 : vector<8x1xf32>
      %c0_17 = arith.constant 0 : index
      %c0_18 = arith.constant 0 : index
      %30 = vector.load %arg8[%c0_17, %c0_18] : memref<8x1xf32, #tpu.memory_space<vmem>>, vector<8x1xf32>
      tpu.vector_store %arg8[%c0_17, %c0_18], %29 {strides = array<i32>} : memref<8x1xf32, #tpu.memory_space<vmem>>, vector<8x1xf32>,
    } else {
    }
    %c1_i32 = arith.constant 1 : i32
    %16 = arith.cmpi eq, %arg0, %c1_i32 : i32
    %17 = arith.extui %16 : i1 to i32
    %c0_i32_7 = arith.constant 0 : i32
    %18 = arith.cmpi ne, %17, %c0_i32_7 : i32
    scf.if %18 {
      %c0_i32_8 = arith.constant 0 : i32
      %19 = arith.cmpi eq, %arg1, %c0_i32_8 : i32
      %20 = arith.extui %19 : i1 to i32
      %c0_i32_9 = arith.constant 0 : i32
      %21 = arith.cmpi ne, %20, %c0_i32_9 : i32
      scf.if %21 {
        %c0_22 = arith.constant 0 : index
        %c0_23 = arith.constant 0 : index
        %44 = vector.load %arg7[%c0_22, %c0_23] : memref<8x32xf32, #tpu.memory_space<vmem>>, vector<8x32xf32>
        %c0_24 = arith.constant 0 : index
        %c0_25 = arith.constant 0 : index
        %45 = vector.load %arg8[%c0_24, %c0_25] : memref<8x1xf32, #tpu.memory_space<vmem>>, vector<8x1xf32>
        %cst_26 = arith.constant 1.000000e+00 : f32
        %46 = vector.broadcast %cst_26 : f32 to vector<8x1xf32>
        %47 = arith.maximumf %45, %46 : vector<8x1xf32>
        %48 = vector.broadcast %47 : vector<8x1xf32> to vector<8x32xf32>
        %49 = arith.divf %44, %48 : vector<8x32xf32>
        %c0_27 = arith.constant 0 : index
        %c0_28 = arith.constant 0 : index
        %50 = vector.load %arg5[%c0_27, %c0_28] : memref<32x32xf32, #tpu.memory_space<vmem>>, vector<32x32xf32>
        %cst_29 = arith.constant dense<0.000000e+00> : vector<8x32xf32>
        %51 = tpu.matmul %49, %50, %cst_29 {dimension_numbers = #tpu.dot_dimension_numbers<[1], [0], [0], [1], [0, 0, 1, 1], [], []>} : vector<8x32xf32>, vector<32x32xf32>, vector<8x32xf32> -> vector<8x32xf32>
        %52 = math.tanh %51 : vector<8x32xf32>
        %53 = tpu.transpose %52, [1, 0] : vector<8x32xf32> -> vector<32x8xf32>
        %c0_30 = arith.constant 0 : index
        %c0_31 = arith.constant 0 : index
        %54 = vector.load %arg9[%c0_30, %c0_31] : memref<32x8xf32, #tpu.memory_space<vmem>>, vector<32x8xf32>
        tpu.vector_store %arg9[%c0_30, %c0_31], %53 {strides = array<i32>} : memref<32x8xf32, #tpu.memory_space<vmem>>, vector<32x8xf32>,
      } else {
      }
      %c0_10 = arith.constant 0 : index
      %c0_11 = arith.constant 0 : index
      %22 = vector.load %arg9[%c0_10, %c0_11] : memref<32x8xf32, #tpu.memory_space<vmem>>, vector<32x8xf32>
      %cst = arith.constant dense<0.000000e+00> : vector<128x8xf32>
      %23 = tpu.matmul %12, %22, %cst {dimension_numbers = #tpu.dot_dimension_numbers<[1], [0], [0], [1], [0, 0, 1, 1], [], []>} : vector<128x32xf32>, vector<32x8xf32>, vector<128x8xf32> -> vector<128x8xf32>
      %c0_12 = arith.constant 0 : index
      %c0_13 = arith.constant 0 : index
      %24 = vector.load %arg3[%c0_12, %c0_13] : memref<128x1xi32, #tpu.memory_space<vmem>>, vector<128x1xi32>
      %25 = tpu.iota {dimensions = array<i32: 1>} : vector<1x8xi32>
      %26 = vector.broadcast %25 : vector<1x8xi32> to vector<128x8xi32>
      %27 = vector.broadcast %24 : vector<128x1xi32> to vector<128x8xi32>
      %28 = arith.cmpi eq, %26, %27 : vector<128x8xi32>
      %cst_14 = arith.constant 0.000000e+00 : f32
      %29 = vector.broadcast %cst_14 : f32 to vector<128x8xf32>
      %30 = arith.select %28, %23, %29 : vector<128x8xi1>, vector<128x8xf32>
      %cst_15 = arith.constant dense<0.000000e+00> : vector<128xf32>
      %31 = vector.multi_reduction <add>, %30, %cst_15 [1] : vector<128x8xf32> to vector<128xf32>
      %32 = vector.shape_cast %31 : vector<128xf32> to vector<128x1xf32>
      %33 = arith.negf %32 : vector<128x1xf32>
      %34 = math.exp %33 : vector<128x1xf32>
      %cst_16 = arith.constant 1.000000e+00 : f32
      %35 = vector.broadcast %cst_16 : f32 to vector<128x1xf32>
      %36 = arith.addf %35, %34 : vector<128x1xf32>
      %37 = arith.divf %35, %36 : vector<128x1xf32>
      %38 = vector.broadcast %37 : vector<128x1xf32> to vector<128x32xf32>
      %39 = arith.mulf %12, %38 : vector<128x32xf32>
      %c0_17 = arith.constant 0 : index
      %c0_18 = arith.constant 0 : index
      %40 = vector.load %arg6[%c0_17, %c0_18] : memref<8x32xf32, #tpu.memory_space<vmem>>, vector<8x32xf32>
      %cst_19 = arith.constant dense<0.000000e+00> : vector<8x32xf32>
      %41 = tpu.matmul %11, %39, %cst_19 {dimension_numbers = #tpu.dot_dimension_numbers<[1], [0], [0], [1], [0, 0, 1, 1], [], []>} : vector<8x128xf32>, vector<128x32xf32>, vector<8x32xf32> -> vector<8x32xf32>
      %42 = arith.addf %40, %41 : vector<8x32xf32>
      %c0_20 = arith.constant 0 : index
      %c0_21 = arith.constant 0 : index
      %43 = vector.load %arg6[%c0_20, %c0_21] : memref<8x32xf32, #tpu.memory_space<vmem>>, vector<8x32xf32>
      tpu.vector_store %arg6[%c0_20, %c0_21], %42 {strides = array<i32>} : memref<8x32xf32, #tpu.memory_space<vmem>>, vector<8x32xf32>,
    } else {
    }
    return
  }
  func.func @transform_0(%arg0: i32, %arg1: i32) -> (i32, i32) {
    %c0_i32 = arith.constant 0 : i32
    %c0_i32_0 = arith.constant 0 : i32
    return %c0_i32, %arg1 : i32, i32
  }
  func.func @transform_1(%arg0: i32, %arg1: i32) -> (i32, i32) {
    %c0_i32 = arith.constant 0 : i32
    %c0_i32_0 = arith.constant 0 : i32
    return %arg1, %c0_i32 : i32, i32
  }
  func.func @transform_2(%arg0: i32, %arg1: i32) -> (i32, i32) {
    %c0_i32 = arith.constant 0 : i32
    %c0_i32_0 = arith.constant 0 : i32
    return %arg1, %c0_i32 : i32, i32
  }
  func.func @transform_3(%arg0: i32, %arg1: i32) -> (i32, i32) {
    %c0_i32 = arith.constant 0 : i32
    %c0_i32_0 = arith.constant 0 : i32
    %c0_i32_1 = arith.constant 0 : i32
    return %c0_i32, %c0_i32_0 : i32, i32
  }
  func.func @transform_4(%arg0: i32, %arg1: i32) -> (i32, i32) {
    %c0_i32 = arith.constant 0 : i32
    %c0_i32_0 = arith.constant 0 : i32
    %c0_i32_1 = arith.constant 0 : i32
    return %c0_i32, %c0_i32_0 : i32, i32
  }
}

</mosaic_0001>

<bundles_post_ra>
// kernel: tpu_custom_call.1
= control target key start
LH: loop header
LB: loop body
LE: loop exit
PB: predicated region body
PF: predicated region fallthrough
CT: control target
= control target key end

     0   :  { %9 = vsyncpa [#allocation6], 0  ;;  %s1347_s15 = smov 0   ;;  %s1349_s16 = smov 0   ;;  %s2047_s0 = inlined_call_operand.vmem [shape: s32[1,128], index: 0, kind: input, shape index: {}]   ;;  %s2048_s1 = inlined_call_operand.vmem [shape: s32[128,1], index: 1, kind: input, shape index: {}]   ;;  %s2049_s2 = inlined_call_operand.vmem [shape: f32[128,32], index: 2, kind: input, shape index: {}]   ;;  %s2050_s3 = inlined_call_operand.vmem [shape: f32[32,32], index: 3, kind: input, shape index: {}]   ;;  %s2051_s4 = inlined_call_operand.hbm [shape: f32[8,32], index: 4, kind: output, shape index: {}]  }
   0x1   :  { %s1351_s17 = smov 0  }
   0x2 LB: > { %s1093_s18 = sadd.s32 4294967295, %s1314_s17   ;;  %s27_s19 = sadd.s32 1, %s1310_s16  ;;  %s1314_s17 = sphi %s1351_s17, %s15_s17   ;;  %s1310_s16 = sphi %s1349_s16, %s2103_s16   ;;  %s1306_s15 = sphi %s1347_s15, %s2102_s15  }
   0x3   : > { %p29_p0 = scmp.ge.s32.totalorder %s27_s19, 2  ;;  %p1098_p1 = scmp.ge.s32.totalorder %s1314_s17, 1 }
   0x4   : > { %p190_p2 = scmp.lt.s32.totalorder %s1314_s17, 3 }
   0x5   : > { %s2105_s19 = smov (%p29_p0, %s27_s19), 0 }
   0x6   : > { %p191_p3 = pnand %p1098_p1, %p190_p2 }
   0x7   : > { %p234_p4 = scmp.eq.s32.totalorder (!%p191_p3), %s1306_s15, 0 }
   0x8   : > { %194 = sbr.rel (%p191_p3) target bundleno = 1161 (0x489), region = 36 }
   0xd   : > { %239 = sbr.rel (!%p234_p4) target bundleno = 18 (0x12), region = 40  ;;  %vm240_vm0 = vcmask (%p234_p4), 261120   ;;  %vm242_vm1 = vcmask (%p234_p4), 7168   ;;  %v1316_v0 = vmov (%p234_p4), 0.0  }
   0xe   : > { %241 = vst.msk [vmem:[#allocation2] sm:$0xff] (%p234_p4), %vm240_vm0, %v1316_v0 }
   0xf   : > { %244 = vst.msk [vmem:[#allocation5] sm:$0xff] (%p234_p4), %vm240_vm0, %v1316_v0 }
  0x10   : > { %243 = vst.msk [vmem:[#allocation3] sm:$0xff] (%p234_p4), %vm242_vm1, %v1316_v0 }
  0x12 PF: > { %v246_v1 = vlaneseq  ;;  %v1372_v2 = vld [vmem:[%s2047_s0] ss:$0 sm:$0xff]  ;;  %v1382_v4 = vld [vmem:[%s2049_s2 + $0x8] sm:$0xff]  ;;  %v1387_v5 = vld [vmem:[%s2049_s2 + $0x10] sm:$0xff]  ;;  %p1101_p5 = scmp.ne.s32.totalorder %s1306_s15, 0 }
  0x13   : > { %v1377_v3 = vld [vmem:[%s2049_s2] sm:$0xff]  ;;  %v1392_v6 = vld [vmem:[%s2049_s2 + $0x18] sm:$0xff]  ;;  %v1405_v9 = vld [vmem:[%s2049_s2 + $0x28] sm:$0xff] }
  0x14   : > { %v1395_v7 = vshrl.u32 %v246_v1, 7  ;;  %v1400_v8 = vld [vmem:[%s2049_s2 + $0x20] sm:$0xff]  ;;  %v1410_v10 = vld [vmem:[%s2049_s2 + $0x30] sm:$0xff]  ;;  %v1415_v11 = vld [vmem:[%s2049_s2 + $0x38] sm:$0xff]  ;;  %270 = sbr.rel (%p1101_p5) target bundleno = 185 (0xb9), region = 44 }
  0x15   : > { %v1420_v12 = vld [vmem:[%s2049_s2 + $0x40] sm:$0xff]  ;;  %v1425_v13 = vld [vmem:[%s2049_s2 + $0x48] sm:$0xff]  ;;  %v1432_v14 = vld [vmem:[%s2049_s2 + $0x50] sm:$0xff] }
  0x16   : > { %vm249_vm2 = vcmp.eq.s32.totalorder %v1395_v7, %v1372_v2  ;;  %v1437_v15 = vld [vmem:[%s2049_s2 + $0x58] sm:$0xff]  ;;  %v1442_v16 = vld [vmem:[%s2049_s2 + $0x60] sm:$0xff]  ;;  %v1447_v17 = vld [vmem:[%s2049_s2 + $0x68] sm:$0xff] }
  0x17   : > { %v1452_v18 = vld [vmem:[%s2049_s2 + $0x70] sm:$0xff]  ;;  %v1457_v19 = vld [vmem:[%s2049_s2 + $0x78] sm:$0xff] }
  0x19   : > { %272 = vmatpush.msra.mxu0 %v1457_v19  ;;  %v1317_v20 = vmov 0.0   ;;  %v1318_v22 = vmov 1.0   ;;  %v295_v23 = vld [vmem:[#allocation3] sm:$0xff]  ;;  %vm300_vm3 = vcmask 7168   ;;  %v271_v26 = vld [vmem:[#allocation2] sm:$0xff]  ;;  %vm293_vm4 = vcmask 261120  }
  0x1a   : > { %v296_v21 = vsel %vm249_vm2, 1.0, %v1317_v20 }
  0x1b   : > { %273 = vmatpush.msra.mxu0 %v1452_v18  ;;  %297 = vadd.xlane.f32.xlu0 %v296_v21 }
  0x1d   : > { %274 = vmatpush.msra.mxu0 %v1447_v17 }
  0x1f   : > { %275 = vmatpush.msra.mxu0 %v1442_v16 }
  0x21   : > { %276 = vmatpush.msra.mxu0 %v1437_v15 }
  0x23   : > { %277 = vmatpush.msra.mxu0 %v1432_v14 }
  0x25   : > { %278 = vmatpush.msra.mxu0 %v1425_v13 }
  0x27   : > { %279 = vmatpush.msra.mxu0 %v1420_v12 }
  0x29   : > { %280 = vmatpush.msra.mxu0 %v1415_v11 }
  0x2b   : > { %281 = vmatpush.msra.mxu0 %v1410_v10 }
  0x2d   : > { %282 = vmatpush.msra.mxu0 %v1405_v9 }
  0x2f   : > { %283 = vmatpush.msra.mxu0 %v1400_v8 }
  0x31   : > { %284 = vmatpush.msra.mxu0 %v1392_v6 }
  0x33   : > { %285 = vmatpush.msra.mxu0 %v1387_v5 }
  0x35   : > { %286 = vmatpush.msra.mxu0 %v1382_v4 }
  0x37   : > { %287 = vmatpush.msra.mxu0 %v1377_v3 }
  0x38   : > { %1102 = vmatmul.msk.f32.vlgmr.msra.gmra.mxu0 %vm249_vm2, %v1318_v22 }
  0x8e   : > { %v298_v24 = vpop.xlane.xlu0 %297 }
  0x8f   : > { %v299_v25 = vadd.f32 %v298_v24, %v295_v23 }
  0x91   : > { %301 = vst.msk [vmem:[#allocation3] sm:$0xff] %vm300_vm3, %v299_v25 }
  0xb5   : > { %v289_v27 = vpop.f32.mrf.mxu0 }
  0xb6   : > { %v292_v28 = vadd.f32 %v289_v27, %v271_v26 }
  0xb8   : > { %294 = vst.msk [vmem:[#allocation2] sm:$0xff] %vm293_vm4, %v292_v28 }
  0xb9 PF: > { %p1103_p6 = scmp.ne.s32.totalorder %s1306_s15, 1 }
  0xbb   : > { %305 = sbr.rel (%p1103_p6) target bundleno = 1155 (0x483), region = 48 }
  0xc0   : > { %v310_v29 = vld [vmem:[#allocation3] sm:$0xff]  ;;  %v1319_v30 = vmov 0   ;;  %v335_v32 = vld [vmem:[%s2050_s3 + $0x18] sm:$0xff]  ;;  %v334_v33 = vld [vmem:[%s2050_s3 + $0x10] sm:$0xff]  ;;  %vm336_vm9 = vcmask 261120   ;;  %vm393_vm10 = vcmask 64512  }
  0xc1   : > { %1189 = vset.pattern.permute.xlu0 %v1319_v30  ;;  %v311_v31 = vmax.f32 %v310_v29, 1.0  ;;  %1190 = vset.pattern.permute.xlu1 %v1319_v30  ;;  %v333_v34 = vld [vmem:[%s2050_s3 + $0x8] sm:$0xff]  ;;  %v332_v35 = vld [vmem:[%s2050_s3] sm:$0xff]  ;;  %v531_v51 = vld [vmem:[%s2048_s1 + $0x78] sm:$0xff] }
  0xc2   : > { %1191 = vset.pattern.permute.xlu2 %v1319_v30  ;;  %352 = vmatpush.msra.mxu0 %v335_v32  ;;  %v309_v45 = vld [vmem:[#allocation2] sm:$0xff]  ;;  %v519_v52 = vld [vmem:[%s2048_s1 + $0x18] sm:$0xff]  ;;  %v530_v53 = vld [vmem:[%s2048_s1 + $0x70] sm:$0xff] }
  0xc3   : > { %314 = vperm.xlu0 %1189, %v311_v31   ;;  %580 = vperm.xlu1 %1190, %v531_v51   ;;  %v527_v54 = vld [vmem:[%s2048_s1 + $0x58] sm:$0xff]  ;;  %v525_v55 = vld [vmem:[%s2048_s1 + $0x48] sm:$0xff]  ;;  %v528_v58 = vld [vmem:[%s2048_s1 + $0x60] sm:$0xff] }
  0xc4   : > { %353 = vmatpush.msra.mxu0 %v334_v33  ;;  %v529_v56 = vld [vmem:[%s2048_s1 + $0x68] sm:$0xff]  ;;  %v523_v57 = vld [vmem:[%s2048_s1 + $0x38] sm:$0xff]  ;;  %v526_v62 = vld [vmem:[%s2048_s1 + $0x50] sm:$0xff] }
  0xc5   : > { %574 = vperm.xlu2 %1191, %v529_v56   ;;  %v521_v60 = vld [vmem:[%s2048_s1 + $0x28] sm:$0xff]  ;;  %v518_v63 = vld [vmem:[%s2048_s1 + $0x10] sm:$0xff]  ;;  %v524_v0 = vld [vmem:[%s2048_s1 + $0x40] sm:$0xff] }
  0xc6   : > { %354 = vmatpush.msra.mxu0 %v333_v34  ;;  %v516_v21 = vld [vmem:[%s2048_s1] sm:$0xff]  ;;  %v522_v22 = vld [vmem:[%s2048_s1 + $0x30] sm:$0xff]  ;;  %v517_v29 = vld [vmem:[%s2048_s1 + $0x8] sm:$0xff] }
  0xc7   : > { %v520_v24 = vld [vmem:[%s2048_s1 + $0x20] sm:$0xff] }
  0xc8   : > { %355 = vmatpush.msra.mxu0 %v332_v35 }
  0xcb   : > { %577 = vperm.xlu1 %1190, %v530_v53  }
  0xcd   : > { %571 = vperm.xlu2 %1191, %v528_v58  }
  0xd3   : > { %568 = vperm.xlu1 %1190, %v527_v54  }
  0xd5   : > { %565 = vperm.xlu2 %1191, %v526_v62  }
  0xdb   : > { %562 = vperm.xlu1 %1190, %v525_v55  }
  0xdd   : > { %559 = vperm.xlu2 %1191, %v524_v0  }
  0xe3   : > { %556 = vperm.xlu1 %1190, %v523_v57  }
  0xe5   : > { %553 = vperm.xlu2 %1191, %v522_v22  }
  0xeb   : > { %550 = vperm.xlu1 %1190, %v521_v60  }
  0xed   : > { %547 = vperm.xlu2 %1191, %v520_v24  }
  0xf3   : > { %541 = vperm.xlu1 %1190, %v518_v63  }
  0xf5   : > { %538 = vperm.xlu2 %1191, %v517_v29  }
  0xfb   : > { %535 = vperm.xlu1 %1190, %v516_v21  }
 0x11f   : > { %v575_v31 = vpop.permute.xlu2 %574 }
 0x127   : > { %v572_v33 = vpop.permute.xlu2 %571 }
 0x135   : > { %v315_v36 = vpop.permute.xlu0 %314  ;;  %v581_v30 = vpop.permute.xlu1 %580 }
 0x136   : > { %1192 = vrcp.f32 %v315_v36  ;;  %v328_v40 = vand.u32 2147483648, %v315_v36  ;;  %v326_v42 = vand.u32 2147483647, %v315_v36  ;;  %vm322_vm6 = vweird.f32 %v315_v36 }
 0x138   : > { %v329_v44 = vor.u32 1.1754944e-38, %v328_v40  ;;  %vm327_vm8 = vcmp.eq.f32.partialorder %v326_v42, 8.507059e+37 }
 0x13c   : > { %v1193_v37 = vpop.eup %1192 }
 0x13d   : > { %v318_v38 = vmul.f32 %v1193_v37, %v315_v36  ;;  %vm323_vm5 = vweird.f32 %v1193_v37  ;;  %v578_v32 = vpop.permute.xlu1 %577  ;;  %v1583_v36 = vand.u32 127, %v246_v1 }
 0x13e   : > { %vm324_vm7 = vmor %vm322_vm6, %vm323_vm5 }
 0x13f   : > { %v319_v39 = vsub.f32 1.0, %v318_v38  ;;  %vm594_vm13 = vcmp.eq.s32.totalorder %v1583_v36, %v572_v33  ;;  %vm595_vm15 = vcmp.eq.s32.totalorder %v1583_v36, %v575_v31  ;;  %vm596_vm1 = vcmp.eq.s32.totalorder %v1583_v36, %v578_v32 }
 0x140   : > { %vm597_vm4 = vcmp.eq.s32.totalorder %v1583_v36, %v581_v30 }
 0x141   : > { %v320_v41 = vmul.f32 %v1193_v37, %v319_v39 }
 0x143   : > { %v321_v43 = vadd.f32 %v1193_v37, %v320_v41 }
 0x145   : > { %v325_v46 = vsel %vm324_vm7, %v1193_v37, %v321_v43  ;;  %v569_v35 = vpop.permute.xlu1 %568  ;;  %v566_v37 = vpop.permute.xlu2 %565 }
 0x146   : > { %v330_v47 = vsel %vm327_vm8, %v329_v44, %v325_v46  ;;  %vm592_vm11 = vcmp.eq.s32.totalorder %v1583_v36, %v566_v37  ;;  %vm593_vm12 = vcmp.eq.s32.totalorder %v1583_v36, %v569_v35 }
 0x147   : > { %v331_v48 = vmul.f32 %v330_v47, %v309_v45 }
 0x149   : > { %1104 = vmatmul.msk.f32.vlgmr.msra.gmra.mxu0 %vm336_vm9, %v331_v48 }
 0x14d   : > { %v563_v42 = vpop.permute.xlu1 %562  ;;  %v560_v58 = vpop.permute.xlu2 %559 }
 0x14e   : > { %vm590_vm0 = vcmp.eq.s32.totalorder %v1583_v36, %v560_v58  ;;  %vm591_vm3 = vcmp.eq.s32.totalorder %v1583_v36, %v563_v42 }
 0x155   : > { %v557_v47 = vpop.permute.xlu1 %556  ;;  %v554_v21 = vpop.permute.xlu2 %553 }
 0x156   : > { %vm589_vm14 = vcmp.eq.s32.totalorder %v1583_v36, %v557_v47  ;;  %vm588_vm5 = vcmp.eq.s32.totalorder %v1583_v36, %v554_v21 }
 0x15d   : > { %v548_v32 = vpop.permute.xlu2 %547 }
 0x15e   : > { %vm586_vm8 = vcmp.eq.s32.totalorder %v1583_v36, %v548_v32 }
 0x1c6   : > { %v357_v49 = vpop.f32.mrf.mxu0 }
 0x1c7   : > { %1194 = vtanh.f32 %v357_v49 }
 0x1cd   : > { %v1195_v50 = vpop.eup %1194 }
 0x1ce   : > { %361 = vxpose.xlu0.b32.start.end [1/1] (short) (narrow) %v1195_v50, 32 }
 0x254   : > { %544 = vperm.xlu0 %1189, %v519_v52  }
 0x272   : > { %v377_v59 = vpop.trf.xlu0 }
 0x273   : > { %394 = vst.msk [vmem:[#allocation4] sm:$0xff] %vm393_vm10, %v377_v59 }
 0x27a   : > { %v378_v61 = vpop.trf.xlu0  ;;  %v398_v28 = vld [vmem:[#allocation4] sm:$0xff] }
 0x27b   : > { %395 = vst.msk [vmem:[#allocation4 + $0x8] sm:$0xff] %vm393_vm10, %v378_v61 }
 0x282   : > { %v379_v20 = vpop.trf.xlu0  ;;  %v399_v27 = vld [vmem:[#allocation4 + $0x8] sm:$0xff] }
 0x283   : > { %396 = vst.msk [vmem:[#allocation4 + $0x10] sm:$0xff] %vm393_vm10, %v379_v20 }
 0x28a   : > { %v380_v23 = vpop.trf.xlu0  ;;  %v400_v26 = vld [vmem:[#allocation4 + $0x10] sm:$0xff] }
 0x28b   : > { %397 = vst.msk [vmem:[#allocation4 + $0x18] sm:$0xff] %vm393_vm10, %v380_v23 }
 0x292   : > { %v401_v25 = vld [vmem:[#allocation4 + $0x18] sm:$0xff] }
 0x293   : > { %463 = vmatpush.msrb.mxu0 %v401_v25  ;;  %1143 = vmatpush.msra.mxu1 %v401_v25 }
 0x294   : > { %1144 = vmatpush.msra.mxu3 %v401_v25 }
 0x295   : > { %464 = vmatpush.msrb.mxu0 %v400_v26  ;;  %1145 = vmatpush.msra.mxu1 %v400_v26 }
 0x296   : > { %1146 = vmatpush.msra.mxu3 %v400_v26 }
 0x297   : > { %465 = vmatpush.msrb.mxu0 %v399_v27  ;;  %1147 = vmatpush.msra.mxu1 %v399_v27 }
 0x298   : > { %1148 = vmatpush.msra.mxu3 %v399_v27 }
 0x299   : > { %466 = vmatpush.msrb.mxu0 %v398_v28  ;;  %1149 = vmatpush.msra.mxu1 %v398_v28 }
 0x29a   : > { %1150 = vmatpush.msra.mxu3 %v398_v28  ;;  %1105 = vmatmul.msk.f32.vlgmr.msrb.gmra.mxu0 %vm336_vm9, %v1377_v3  ;;  %v551_v28 = vpop.permute.xlu1 %550 }
 0x29b   : > { %1109 = vmatmul.msk.f32.vlgmr.msra.gmra.mxu1 %vm336_vm9, %v1400_v8  ;;  %1115 = vmatmul.msk.f32.vlgmr.msra.gmra.mxu3 %vm336_vm9, %v1432_v14  ;;  %vm587_vm6 = vcmp.eq.s32.totalorder %v1583_v36, %v551_v28 }
 0x2a2   : > { %1106 = vmatmul.msk.f32.gmra.mxu0 %vm336_vm9, %v1382_v4 }
 0x2a3   : > { %1110 = vmatmul.msk.f32.gmra.mxu1 %vm336_vm9, %v1405_v9  ;;  %1116 = vmatmul.msk.f32.gmra.mxu3 %vm336_vm9, %v1437_v15 }
 0x2aa   : > { %1107 = vmatmul.msk.f32.gmra.mxu0 %vm336_vm9, %v1387_v5 }
 0x2ab   : > { %1111 = vmatmul.msk.f32.gmra.mxu1 %vm336_vm9, %v1410_v10  ;;  %1117 = vmatmul.msk.f32.gmra.mxu3 %vm336_vm9, %v1442_v16 }
 0x2b2   : > { %1108 = vmatmul.msk.f32.gmra.mxu0 %vm336_vm9, %v1392_v6 }
 0x2b3   : > { %1112 = vmatmul.msk.f32.gmra.mxu1 %vm336_vm9, %v1415_v11  ;;  %1118 = vmatmul.msk.f32.gmra.mxu3 %vm336_vm9, %v1447_v17 }
 0x2bb   : > { %1113 = vmatmul.msk.f32.gmra.mxu1 %vm336_vm9, %v1420_v12  ;;  %1119 = vmatmul.msk.f32.gmra.mxu3 %vm336_vm9, %v1452_v18 }
 0x2c3   : > { %1114 = vmatmul.msk.f32.gmra.mxu1 %vm336_vm9, %v1425_v13  ;;  %1120 = vmatmul.msk.f32.gmra.mxu3 %vm336_vm9, %v1457_v19 }
 0x2c6   : > { %v545_v35 = vpop.permute.xlu0 %544 }
 0x2c7   : > { %vm585_vm7 = vcmp.eq.s32.totalorder %v1583_v36, %v545_v35 }
 0x317   : > { %v468_v53 = vpop.f32.mrf.mxu0 }
 0x318   : > { %v1580_v34 = vpop.f32.mrf.mxu1 }
 0x31e   : > { %v498_v38 = vpop.f32.mrf.mxu3 }
 0x31f   : > { %v608_v39 = vsel %vm592_vm11, %v498_v38, 0.0  ;;  %v471_v60 = vpop.f32.mrf.mxu0  ;;  %v542_v38 = vpop.permute.xlu1 %541 }
 0x320   : > { %v483_v40 = vpop.f32.mrf.mxu1  ;;  %v645_v41 = vsel %vm393_vm10, %v608_v39, 0.0  ;;  %v602_v39 = vsel %vm586_vm8, %v1580_v34, 0.0  ;;  %vm584_vm11 = vcmp.eq.s32.totalorder %v1583_v36, %v542_v38 }
 0x321   : > { %646 = vadd.xlane.f32.xlu2 %v645_v41  ;;  %v603_v29 = vsel %vm587_vm6, %v483_v40, 0.0  ;;  %v627_v40 = vsel %vm393_vm10, %v602_v39, 0.0 }
 0x322   : > { %v630_v30 = vsel %vm393_vm10, %v603_v29, 0.0 }
 0x326   : > { %v501_v43 = vpop.f32.mrf.mxu3 }
 0x327   : > { %v609_v44 = vsel %vm593_vm12, %v501_v43, 0.0  ;;  %v474_v25 = vpop.f32.mrf.mxu0  ;;  %v539_v43 = vpop.permute.xlu2 %538 }
 0x328   : > { %v486_v45 = vpop.f32.mrf.mxu1  ;;  %v648_v46 = vsel %vm393_vm10, %v609_v44, 0.0  ;;  %vm583_vm12 = vcmp.eq.s32.totalorder %v1583_v36, %v539_v43 }
 0x329   : > { %649 = vadd.xlane.f32.xlu1 %v648_v46  ;;  %v604_v31 = vsel %vm588_vm5, %v486_v45, 0.0  ;;  %v599_v44 = vsel %vm583_vm12, %v471_v60, 0.0  ;;  %v600_v45 = vsel %vm584_vm11, %v474_v25, 0.0  ;;  %v536_v46 = vpop.permute.xlu1 %535 }
 0x32a   : > { %v633_v33 = vsel %vm393_vm10, %v604_v31, 0.0  ;;  %v618_v47 = vsel %vm393_vm10, %v599_v44, 0.0 }
 0x32e   : > { %v504_v1 = vpop.f32.mrf.mxu3 }
 0x32f   : > { %v610_v48 = vsel %vm594_vm13, %v504_v1, 0.0  ;;  %v477_v37 = vpop.f32.mrf.mxu0  ;;  %v621_v1 = vsel %vm393_vm10, %v600_v45, 0.0  ;;  %vm582_vm13 = vcmp.eq.s32.totalorder %v1583_v36, %v536_v46 }
 0x330   : > { %v489_v49 = vpop.f32.mrf.mxu1  ;;  %v651_v50 = vsel %vm393_vm10, %v610_v48, 0.0  ;;  %v601_v41 = vsel %vm585_vm7, %v477_v37, 0.0  ;;  %v598_v34 = vsel %vm582_vm13, %v468_v53, 0.0 }
 0x331   : > { %v605_v51 = vsel %vm589_vm14, %v489_v49, 0.0  ;;  %652 = vadd.xlane.f32.xlu2 %v651_v50  ;;  %v624_v42 = vsel %vm393_vm10, %v601_v41, 0.0  ;;  %v615_v48 = vsel %vm393_vm10, %v598_v34, 0.0 }
 0x332   : > { %v636_v52 = vsel %vm393_vm10, %v605_v51, 0.0 }
 0x333   : > { %637 = vadd.xlane.f32.xlu1 %v636_v52 }
 0x336   : > { %v507_v54 = vpop.f32.mrf.mxu3 }
 0x337   : > { %v611_v55 = vsel %vm595_vm15, %v507_v54, 0.0 }
 0x338   : > { %v492_v56 = vpop.f32.mrf.mxu1  ;;  %v654_v57 = vsel %vm393_vm10, %v611_v55, 0.0 }
 0x339   : > { %655 = vadd.xlane.f32.xlu2 %v654_v57  ;;  %v606_v59 = vsel %vm590_vm0, %v492_v56, 0.0 }
 0x33a   : > { %v639_v0 = vsel %vm393_vm10, %v606_v59, 0.0 }
 0x33e   : > { %v510_v61 = vpop.f32.mrf.mxu3 }
 0x33f   : > { %v612_v62 = vsel %vm596_vm1, %v510_v61, 0.0 }
 0x340   : > { %v657_v63 = vsel %vm393_vm10, %v612_v62, 0.0  ;;  %v495_v20 = vpop.f32.mrf.mxu1 }
 0x341   : > { %658 = vadd.xlane.f32.xlu1 %v657_v63  ;;  %640 = vadd.xlane.f32.xlu2 %v639_v0  ;;  %v607_v22 = vsel %vm591_vm3, %v495_v20, 0.0 }
 0x342   : > { %v642_v27 = vsel %vm393_vm10, %v607_v22, 0.0 }
 0x346   : > { %v513_v23 = vpop.f32.mrf.mxu3 }
 0x347   : > { %v613_v24 = vsel %vm597_vm4, %v513_v23, 0.0 }
 0x348   : > { %v660_v26 = vsel %vm393_vm10, %v613_v24, 0.0 }
 0x349   : > { %661 = vadd.xlane.f32.xlu2 %v660_v26  ;;  %643 = vadd.xlane.f32.xlu1 %v642_v27 }
 0x351   : > { %634 = vadd.xlane.f32.xlu2 %v633_v33  ;;  %631 = vadd.xlane.f32.xlu1 %v630_v30 }
 0x359   : > { %628 = vadd.xlane.f32.xlu2 %v627_v40  ;;  %625 = vadd.xlane.f32.xlu1 %v624_v42 }
 0x361   : > { %622 = vadd.xlane.f32.xlu2 %v621_v1  ;;  %619 = vadd.xlane.f32.xlu1 %v618_v47 }
 0x369   : > { %616 = vadd.xlane.f32.xlu2 %v615_v48 }
 0x394   : > { %v647_v49 = vpop.xlane.xlu2 %646 }
 0x395   : > { %v1131_v50 = vmul.f32 -1.442695, %v647_v49 }
 0x397   : > { %1196 = vpow2.f32 %v1131_v50 }
 0x39c   : > { %v650_v51 = vpop.xlane.xlu1 %649 }
 0x39d   : > { %v1197_v52 = vpop.eup %1196  ;;  %v1132_v54 = vmul.f32 -1.442695, %v650_v51 }
 0x39e   : > { %v721_v55 = vadd.f32 1.0, %v1197_v52 }
 0x39f   : > { %1198 = vpow2.f32 %v1132_v54 }
 0x3a0   : > { %1200 = vrcp.f32 %v721_v55  ;;  %v886_v38 = vand.u32 2147483647, %v721_v55  ;;  %v888_v39 = vand.u32 2147483648, %v721_v55  ;;  %vm882_vm14 = vweird.f32 %v721_v55 }
 0x3a2   : > { %vm1654_vm1 = vcmp.eq.f32.partialorder %v886_v38, 8.507059e+37  ;;  %v889_v48 = vor.u32 1.1754944e-38, %v888_v39 }
 0x3a4   : > { %v653_v56 = vpop.xlane.xlu2 %652 }
 0x3a5   : > { %v1199_v57 = vpop.eup %1198  ;;  %v1133_v58 = vmul.f32 -1.442695, %v653_v56 }
 0x3a6   : > { %v1618_v59 = vadd.f32 1.0, %v1199_v57  ;;  %v638_v60 = vpop.xlane.xlu1 %637  ;;  %v1620_v53 = vpop.eup %1200 }
 0x3a7   : > { %1202 = vpow2.f32 %v1133_v58  ;;  %v1128_v36 = vmul.f32 -1.442695, %v638_v60  ;;  %v878_v0 = vmul.f32 %v1620_v53, %v721_v55  ;;  %vm883_vm10 = vweird.f32 %v1620_v53 }
 0x3a8   : > { %v901_v41 = vand.u32 2147483647, %v1618_v59  ;;  %vm897_vm15 = vweird.f32 %v1618_v59  ;;  %v903_v1 = vand.u32 2147483648, %v1618_v59  ;;  %vm1650_vm0 = vmor %vm882_vm14, %vm883_vm10 }
 0x3a9   : > { %1204 = vpow2.f32 %v1128_v36  ;;  %v879_v24 = vsub.f32 1.0, %v878_v0 }
 0x3aa   : > { %1206 = vrcp.f32 %v1618_v59  ;;  %vm1659_vm4 = vcmp.eq.f32.partialorder %v901_v41, 8.507059e+37 }
 0x3ab   : > { %v880_v32 = vmul.f32 %v1620_v53, %v879_v24 }
 0x3ac   : > { %v656_v61 = vpop.xlane.xlu2 %655 }
 0x3ad   : > { %v1203_v62 = vpop.eup %1202  ;;  %v1134_v63 = vmul.f32 -1.442695, %v656_v61  ;;  %v881_v40 = vadd.f32 %v1620_v53, %v880_v32 }
 0x3ae   : > { %v1624_v20 = vadd.f32 1.0, %v1203_v62 }
 0x3af   : > { %v1205_v21 = vpop.eup %1204  ;;  %1208 = vpow2.f32 %v1134_v63  ;;  %v885_v54 = vsel %vm1650_vm0, %v1620_v53, %v881_v40 }
 0x3b0   : > { %v1626_v22 = vpop.eup %1206  ;;  %1210 = vrcp.f32 %v1624_v20  ;;  %v1629_v23 = vadd.f32 1.0, %v1205_v21  ;;  %v916_v58 = vand.u32 2147483647, %v1624_v20  ;;  %v918_v62 = vand.u32 2147483648, %v1624_v20 }
 0x3b1   : > { %v893_v25 = vmul.f32 %v1626_v22, %v1618_v59  ;;  %vm898_vm3 = vweird.f32 %v1626_v22  ;;  %v890_v0 = vsel %vm1654_vm1, %v889_v48, %v885_v54  ;;  %vm912_vm5 = vweird.f32 %v1624_v20 }
 0x3b2   : > { %1212 = vrcp.f32 %v1629_v23  ;;  %v843_v21 = vand.u32 2147483648, %v1629_v23  ;;  %vm1687_vm7 = vcmp.eq.f32.partialorder %v916_v58, 8.507059e+37  ;;  %vm1695_vm8 = vmor %vm897_vm15, %vm898_vm3  ;;  %v919_v39 = vor.u32 1.1754944e-38, %v918_v62 }
 0x3b3   : > { %v894_v37 = vsub.f32 1.0, %v893_v25  ;;  %v904_v25 = vor.u32 1.1754944e-38, %v903_v1  ;;  %v841_v41 = vand.u32 2147483647, %v1629_v23  ;;  %vm837_vm13 = vweird.f32 %v1629_v23 }
 0x3b4   : > { %v659_v26 = vpop.xlane.xlu1 %658  ;;  %v641_v27 = vpop.xlane.xlu2 %640  ;;  %v1709_v40 = vor.u32 1.1754944e-38, %v843_v21 }
 0x3b5   : > { %v1209_v28 = vpop.eup %1208  ;;  %v1135_v29 = vmul.f32 -1.442695, %v659_v26  ;;  %v1129_v31 = vmul.f32 -1.442695, %v641_v27  ;;  %v895_v44 = vmul.f32 %v1626_v22, %v894_v37 }
 0x3b6   : > { %v1635_v33 = vpop.eup %1210  ;;  %v1637_v30 = vadd.f32 1.0, %v1209_v28 }
 0x3b7   : > { %1214 = vpow2.f32 %v1135_v29  ;;  %v908_v35 = vmul.f32 %v1635_v33, %v1624_v20  ;;  %v896_v53 = vadd.f32 %v1626_v22, %v895_v44  ;;  %vm913_vm6 = vweird.f32 %v1635_v33 }
 0x3b8   : > { %1216 = vrcp.f32 %v1637_v30  ;;  %v1645_v43 = vpop.eup %1212  ;;  %v931_v59 = vand.u32 2147483647, %v1637_v30  ;;  %vm927_vm11 = vweird.f32 %v1637_v30  ;;  %vm1717_vm12 = vmor %vm912_vm5, %vm913_vm6 }
 0x3b9   : > { %1218 = vpow2.f32 %v1129_v31  ;;  %v909_v42 = vsub.f32 1.0, %v908_v35  ;;  %v833_v60 = vmul.f32 %v1645_v43, %v1629_v23  ;;  %v900_v32 = vsel %vm1695_vm8, %v1626_v22, %v896_v53 }
 0x3ba   : > { %v1705_v35 = vmul.f32 %v890_v0, %v1432_v14  ;;  %v905_v34 = vsel %vm1659_vm4, %v904_v25, %v900_v32  ;;  %vm1753_vm15 = vcmp.eq.f32.partialorder %v931_v59, 8.507059e+37  ;;  %vm838_vm1 = vweird.f32 %v1645_v43 }
 0x3bb   : > { %v910_v57 = vmul.f32 %v1635_v33, %v909_v42  ;;  %v834_v29 = vsub.f32 1.0, %v833_v60  ;;  %v1758_v53 = vmul.f32 %v905_v34, %v1437_v15  ;;  %vm1779_vm4 = vcmp.eq.f32.partialorder %v841_v41, 8.507059e+37  ;;  %vm1795_vm6 = vmor %vm837_vm13, %vm838_vm1 }
 0x3bc   : > { %v662_v45 = vpop.xlane.xlu2 %661  ;;  %v644_v46 = vpop.xlane.xlu1 %643 }
 0x3bd   : > { %v1215_v49 = vpop.eup %1214  ;;  %v1136_v50 = vmul.f32 -1.442695, %v662_v45  ;;  %v1130_v51 = vmul.f32 -1.442695, %v644_v46  ;;  %v911_v26 = vadd.f32 %v1635_v33, %v910_v57  ;;  %v933_v46 = vand.u32 2147483648, %v1637_v30 }
 0x3be   : > { %v1666_v55 = vpop.eup %1216  ;;  %v1668_v56 = vadd.f32 1.0, %v1215_v49  ;;  %v835_v48 = vmul.f32 %v1645_v43, %v834_v29 }
 0x3bf   : > { %v1219_v36 = vpop.eup %1218  ;;  %1220 = vpow2.f32 %v1136_v50  ;;  %v923_v61 = vmul.f32 %v1666_v55, %v1637_v30  ;;  %v915_v47 = vsel %vm1717_vm12, %v1635_v33, %v911_v26  ;;  %vm928_vm10 = vweird.f32 %v1666_v55 }
 0x3c0   : > { %1222 = vrcp.f32 %v1668_v56  ;;  %v1679_v63 = vadd.f32 1.0, %v1219_v36  ;;  %v946_v33 = vand.u32 2147483647, %v1668_v56  ;;  %v948_v52 = vand.u32 2147483648, %v1668_v56  ;;  %vm1749_vm14 = vmor %vm927_vm11, %vm928_vm10 }
 0x3c1   : > { %1224 = vpow2.f32 %v1130_v51  ;;  %v924_v24 = vsub.f32 1.0, %v923_v61  ;;  %v920_v58 = vsel %vm1687_vm7, %v919_v39, %v915_v47  ;;  %v934_v62 = vor.u32 1.1754944e-38, %v933_v46 }
 0x3c2   : > { %1226 = vrcp.f32 %v1679_v63  ;;  %v858_v60 = vand.u32 2147483648, %v1679_v63  ;;  %vm942_vm0 = vweird.f32 %v1668_v56  ;;  %v1767_v25 = vmul.f32 %v920_v58, %v1442_v16 }
 0x3c3   : > { %v925_v31 = vmul.f32 %v1666_v55, %v924_v24  ;;  %v856_v15 = vand.u32 2147483647, %v1679_v63  ;;  %v836_v27 = vadd.f32 %v1645_v43, %v835_v48  ;;  %vm1773_vm3 = vcmp.eq.f32.partialorder %v946_v33, 8.507059e+37 }
 0x3c4   : > { %v635_v37 = vpop.xlane.xlu2 %634  ;;  %v632_v38 = vpop.xlane.xlu1 %631  ;;  %vm852_vm8 = vweird.f32 %v1679_v63 }
 0x3c5   : > { %v1221_v42 = vpop.eup %1220  ;;  %v1127_v44 = vmul.f32 -1.442695, %v635_v37  ;;  %v1126_v45 = vmul.f32 -1.442695, %v632_v38  ;;  %v926_v50 = vadd.f32 %v1666_v55, %v925_v31  ;;  %v1777_v37 = vor.u32 1.1754944e-38, %v858_v60 }
 0x3c6   : > { %v1721_v22 = vpop.eup %1222  ;;  %v1723_v1 = vadd.f32 1.0, %v1221_v42 }
 0x3c7   : > { %v1225_v20 = vpop.eup %1224  ;;  %1228 = vpow2.f32 %v1127_v44  ;;  %v938_v49 = vmul.f32 %v1721_v22, %v1668_v56  ;;  %v930_v30 = vsel %vm1749_vm14, %v1666_v55, %v926_v50  ;;  %v949_v55 = vor.u32 1.1754944e-38, %v948_v52 }
 0x3c8   : > { %1230 = vrcp.f32 %v1723_v1  ;;  %v1737_v51 = vadd.f32 1.0, %v1225_v20  ;;  %v1741_v54 = vpop.eup %1226  ;;  %v961_v39 = vand.u32 2147483647, %v1723_v1  ;;  %vm943_vm5 = vweird.f32 %v1721_v22 }
 0x3c9   : > { %1232 = vpow2.f32 %v1126_v45  ;;  %v939_v57 = vsub.f32 1.0, %v938_v49  ;;  %v848_v26 = vmul.f32 %v1741_v54, %v1679_v63  ;;  %v935_v42 = vsel %vm1753_vm15, %v934_v62, %v930_v30  ;;  %vm1821_vm13 = vmor %vm942_vm0, %vm943_vm5 }
 0x3ca   : > { %1234 = vrcp.f32 %v1737_v51  ;;  %v963_v48 = vand.u32 2147483648, %v1723_v1  ;;  %v840_v20 = vsel %vm1795_vm6, %v1645_v43, %v836_v27  ;;  %vm957_vm7 = vweird.f32 %v1723_v1 }
 0x3cb   : > { %v940_v0 = vmul.f32 %v1721_v22, %v939_v57  ;;  %v849_v41 = vsub.f32 1.0, %v848_v26  ;;  %vm1813_vm12 = vcmp.eq.f32.partialorder %v961_v39, 8.507059e+37  ;;  %v1826_v33 = vmul.f32 %v935_v42, %v1447_v17 }
 0x3cc   : > { %v629_v21 = vpop.xlane.xlu2 %628  ;;  %v626_v24 = vpop.xlane.xlu1 %625  ;;  %v964_v62 = vor.u32 1.1754944e-38, %v963_v48  ;;  %v871_v56 = vand.u32 2147483647, %v1737_v51  ;;  %vm853_vm10 = vweird.f32 %v1741_v54  ;;  %vm1836_vm14 = vcmp.eq.f32.partialorder %v856_v15, 8.507059e+37 }
 0x3cd   : > { %v1229_v28 = vpop.eup %1228  ;;  %v1125_v29 = vmul.f32 -1.442695, %v629_v21  ;;  %v1124_v31 = vmul.f32 -1.442695, %v626_v24  ;;  %v941_v46 = vadd.f32 %v1721_v22, %v940_v0  ;;  %v850_v60 = vmul.f32 %v1741_v54, %v849_v41 }
 0x3ce   : > { %v1231_v38 = vpop.eup %1230  ;;  %v1783_v59 = vadd.f32 1.0, %v1229_v28  ;;  %v873_v0 = vand.u32 2147483648, %v1737_v51  ;;  %v845_v15 = vsel %vm1779_vm4, %v1709_v40, %v840_v20  ;;  %vm867_vm1 = vweird.f32 %v1737_v51  ;;  %vm1875_vm4 = vmor %vm852_vm8, %vm853_vm10 }
 0x3cf   : > { %v1233_v44 = vpop.eup %1232  ;;  %1236 = vpow2.f32 %v1125_v29  ;;  %v953_v45 = vmul.f32 %v1231_v38, %v1723_v1  ;;  %vm958_vm11 = vweird.f32 %v1231_v38  ;;  %v945_v57 = vsel %vm1821_vm13, %v1721_v22, %v941_v46 }
 0x3d0   : > { %v1799_v47 = vpop.eup %1234  ;;  %1238 = vrcp.f32 %v1783_v59  ;;  %v1802_v34 = vadd.f32 1.0, %v1233_v44  ;;  %vm959_vm15 = vmor %vm957_vm7, %vm958_vm11  ;;  %v950_v29 = vsel %vm1773_vm3, %v949_v55, %v945_v57  ;;  %v851_v44 = vadd.f32 %v1741_v54, %v850_v60 }
 0x3d1   : > { %1240 = vpow2.f32 %v1124_v31  ;;  %v954_v49 = vsub.f32 1.0, %v953_v45  ;;  %v863_v23 = vmul.f32 %v1799_v47, %v1737_v51  ;;  %vm868_vm0 = vweird.f32 %v1799_v47 }
 0x3d2   : > { %1242 = vrcp.f32 %v1802_v34  ;;  %vm1866_vm3 = vcmp.eq.f32.partialorder %v871_v56, 8.507059e+37  ;;  %v981_v51 = vmul.f32 %v950_v29, %v1452_v18  ;;  %vm1884_vm5 = vmor %vm867_vm1, %vm868_vm0  ;;  %v855_v63 = vsel %vm1875_vm4, %v1741_v54, %v851_v44 }
 0x3d3   : > { %v955_v52 = vmul.f32 %v1231_v38, %v954_v49  ;;  %v864_v58 = vsub.f32 1.0, %v863_v23  ;;  %v1892_v48 = vmul.f32 %v845_v15, %v1415_v11  ;;  %vm822_vm6 = vweird.f32 %v1783_v59 }
 0x3d4   : > { %v623_v36 = vpop.xlane.xlu2 %622  ;;  %v620_v61 = vpop.xlane.xlu1 %619  ;;  %v826_v23 = vand.u32 2147483647, %v1783_v59  ;;  %v828_v54 = vand.u32 2147483648, %v1783_v59  ;;  %v811_v11 = vand.u32 2147483647, %v1802_v34  ;;  %v813_v57 = vand.u32 2147483648, %v1802_v34 }
 0x3d5   : > { %v1237_v30 = vpop.eup %1236  ;;  %v1123_v17 = vmul.f32 -1.442695, %v623_v36  ;;  %v1122_v21 = vmul.f32 -1.442695, %v620_v61  ;;  %v956_v24 = vadd.f32 %v1231_v38, %v955_v52  ;;  %v865_v26 = vmul.f32 %v1799_v47, %v864_v58 }
 0x3d6   : > { %v1840_v27 = vpop.eup %1238  ;;  %v1842_v28 = vadd.f32 1.0, %v1237_v30  ;;  %vm1926_vm11 = vcmp.eq.f32.partialorder %v826_v23, 8.507059e+37  ;;  %v829_v29 = vor.u32 1.1754944e-38, %v828_v54 }
 0x3d7   : > { %v1241_v31 = vpop.eup %1240  ;;  %1244 = vpow2.f32 %v1123_v17  ;;  %v960_v39 = vsel %vm959_vm15, %v1231_v38, %v956_v24  ;;  %v866_v42 = vadd.f32 %v1799_v47, %v865_v26  ;;  %v818_v55 = vmul.f32 %v1840_v27, %v1783_v59 }
 0x3d8   : > { %v1855_v45 = vpop.eup %1242  ;;  %1246 = vrcp.f32 %v1842_v28  ;;  %v1858_v1 = vadd.f32 1.0, %v1241_v31  ;;  %v965_v32 = vsel %vm1813_vm12, %v964_v62, %v960_v39  ;;  %v874_v38 = vor.u32 1.1754944e-38, %v873_v0 }
 0x3d9   : > { %1248 = vpow2.f32 %v1122_v21  ;;  %v982_v40 = vmul.f32 %v965_v32, %v1457_v19  ;;  %v819_v41 = vsub.f32 1.0, %v818_v55  ;;  %v803_v19 = vmul.f32 %v1855_v45, %v1802_v34 }
 0x3da   : > { %1250 = vrcp.f32 %v1858_v1  ;;  %v870_v18 = vsel %vm1884_vm5, %v1799_v47, %v866_v42  ;;  %v860_v47 = vsel %vm1836_vm14, %v1777_v37, %v855_v63  ;;  %vm823_vm7 = vweird.f32 %v1840_v27 }
 0x3db   : > { %984 = vmatpush.msra.mxu2 %v982_v40  ;;  %v820_v49 = vmul.f32 %v1840_v27, %v819_v41  ;;  %v804_v50 = vsub.f32 1.0, %v803_v19  ;;  %v875_v62 = vsel %vm1866_vm3, %v874_v38, %v870_v18  ;;  %vm808_vm8 = vweird.f32 %v1855_v45  ;;  %vm1940_vm13 = vmor %vm822_vm6, %vm823_vm7 }
 0x3dc   : > { %v617_v20 = vpop.xlane.xlu2 %616  ;;  %vm807_vm12 = vweird.f32 %v1802_v34  ;;  %v976_v26 = vmul.f32 %v875_v62, %v1425_v13  ;;  %v975_v22 = vmul.f32 %v860_v47, %v1420_v12  ;;  %vm1952_vm14 = vcmp.eq.f32.partialorder %v811_v11, 8.507059e+37 }
 0x3dd   : > { %v1245_v43 = vpop.eup %1244  ;;  %v1121_v52 = vmul.f32 -1.442695, %v617_v20  ;;  %985 = vmatpush.msra.mxu2 %v981_v51  ;;  %v805_v36 = vmul.f32 %v1855_v45, %v804_v50  ;;  %v821_v56 = vadd.f32 %v1840_v27, %v820_v49  ;;  %vm1948_vm10 = vmor %vm807_vm12, %vm808_vm8  ;;  %v796_v39 = vand.u32 2147483647, %v1842_v28 }
 0x3de   : > { %v1903_v58 = vpop.eup %1246  ;;  %v1905_v60 = vadd.f32 1.0, %v1245_v43  ;;  %vm792_vm15 = vweird.f32 %v1842_v28  ;;  %vm777_vm1 = vweird.f32 %v1858_v1  ;;  %v781_v16 = vand.u32 2147483647, %v1858_v1 }
 0x3df   : > { %v1249_v61 = vpop.eup %1248  ;;  %1252 = vpow2.f32 %v1121_v52  ;;  %986 = vmatpush.msra.mxu2 %v1826_v33  ;;  %v788_v0 = vmul.f32 %v1903_v58, %v1842_v28  ;;  %v806_v17 = vadd.f32 %v1855_v45, %v805_v36  ;;  %v825_v34 = vsel %vm1940_vm13, %v1840_v27, %v821_v56 }
 0x3e0   : > { %v1918_v30 = vpop.eup %1250  ;;  %1254 = vrcp.f32 %v1905_v60  ;;  %v1921_v37 = vadd.f32 1.0, %v1249_v61  ;;  %v798_v27 = vand.u32 2147483648, %v1842_v28  ;;  %vm793_vm0 = vweird.f32 %v1903_v58 }
 0x3e1   : > { %987 = vmatpush.msra.mxu2 %v1767_v25  ;;  %v789_v21 = vsub.f32 1.0, %v788_v0  ;;  %v773_v24 = vmul.f32 %v1918_v30, %v1858_v1  ;;  %v810_v31 = vsel %vm1948_vm10, %v1855_v45, %v806_v17  ;;  %v830_v45 = vsel %vm1926_vm11, %v829_v29, %v825_v34  ;;  %vm1981_vm4 = vmor %vm792_vm15, %vm793_vm0 }
 0x3e2   : > { %1256 = vrcp.f32 %v1921_v37  ;;  %vm778_vm3 = vweird.f32 %v1918_v30  ;;  %vm1985_vm5 = vcmp.eq.f32.partialorder %v796_v39, 8.507059e+37  ;;  %v799_v14 = vor.u32 1.1754944e-38, %v798_v27 }
 0x3e3   : > { %988 = vmatpush.msra.mxu2 %v1758_v53  ;;  %v790_v13 = vmul.f32 %v1903_v58, %v789_v21  ;;  %v774_v59 = vsub.f32 1.0, %v773_v24  ;;  %v814_v53 = vor.u32 1.1754944e-38, %v813_v57  ;;  %v783_v63 = vand.u32 2147483648, %v1858_v1  ;;  %vm1998_vm6 = vmor %vm777_vm1, %vm778_vm3 }
 0x3e4   : > { %v973_v20 = vmul.f32 %v830_v45, %v1410_v10  ;;  %vm2002_vm7 = vcmp.eq.f32.partialorder %v781_v16, 8.507059e+37  ;;  %v766_v10 = vand.u32 2147483647, %v1905_v60  ;;  %v768_v52 = vand.u32 2147483648, %v1905_v60 }
 0x3e5   : > { %v1253_v42 = vpop.eup %1252  ;;  %989 = vmatpush.msra.mxu2 %v1705_v35  ;;  %v791_v44 = vadd.f32 %v1903_v58, %v790_v13  ;;  %v775_v32 = vmul.f32 %v1918_v30, %v774_v59  ;;  %v815_v35 = vsel %vm1952_vm14, %v814_v53, %v810_v31  ;;  %v784_v57 = vor.u32 1.1754944e-38, %v783_v63  ;;  %v983_v53 = vld [vmem:[#allocation5] sm:$0xff] }
 0x3e6   : > { %v1255_v55 = vpop.eup %1254  ;;  %v1967_v40 = vadd.f32 1.0, %v1253_v42  ;;  %v972_v23 = vmul.f32 %v815_v35, %v1405_v9  ;;  %vm762_vm11 = vweird.f32 %v1905_v60  ;;  %vm767_vm10 = vcmp.eq.f32.partialorder %v766_v10, 8.507059e+37 }
 0x3e7   : > { %990 = vmatpush.msra.mxu2 %v976_v26  ;;  %v776_v38 = vadd.f32 %v1918_v30, %v775_v32  ;;  %v758_v46 = vmul.f32 %v1255_v55, %v1905_v60  ;;  %v795_v18 = vsel %vm1981_vm4, %v1903_v58, %v791_v44  ;;  %vm763_vm8 = vweird.f32 %v1255_v55 }
 0x3e8   : > { %v1257_v41 = vpop.eup %1256  ;;  %1258 = vrcp.f32 %v1967_v40  ;;  %v800_v11 = vsel %vm1985_vm5, %v799_v14, %v795_v18  ;;  %v753_v58 = vand.u32 2147483648, %v1921_v37  ;;  %vm764_vm13 = vmor %vm762_vm11, %vm763_vm8  ;;  %v769_v56 = vor.u32 1.1754944e-38, %v768_v52 }
 0x3e9   : > { %991 = vmatpush.msra.mxu2 %v975_v22  ;;  %v759_v49 = vsub.f32 1.0, %v758_v46  ;;  %v743_v28 = vmul.f32 %v1257_v41, %v1921_v37  ;;  %v780_v9 = vsel %vm1998_vm6, %v1918_v30, %v776_v38  ;;  %vm748_vm12 = vweird.f32 %v1257_v41 }
 0x3ea   : > { %v785_v62 = vsel %vm2002_vm7, %v784_v57, %v780_v9  ;;  %vm747_vm14 = vweird.f32 %v1921_v37  ;;  %v971_v60 = vmul.f32 %v800_v11, %v1400_v8  ;;  %v754_v21 = vor.u32 1.1754944e-38, %v753_v58 }
 0x3eb   : > { %992 = vmatpush.msra.mxu2 %v1892_v48  ;;  %v760_v54 = vmul.f32 %v1255_v55, %v759_v49  ;;  %v744_v1 = vsub.f32 1.0, %v743_v28  ;;  %v751_v48 = vand.u32 2147483647, %v1921_v37  ;;  %vm749_vm15 = vmor %vm747_vm14, %vm748_vm12  ;;  %v970_v24 = vmul.f32 %v785_v62, %v1392_v6 }
 0x3ec   : > { %v738_v29 = vand.u32 2147483648, %v1967_v40  ;;  %v736_v34 = vand.u32 2147483647, %v1967_v40  ;;  %vm732_vm3 = vweird.f32 %v1967_v40 }
 0x3ed   : > { %993 = vmatpush.msra.mxu2 %v973_v20  ;;  %v761_v47 = vadd.f32 %v1255_v55, %v760_v54  ;;  %v745_v36 = vmul.f32 %v1257_v41, %v744_v1  ;;  %vm752_vm0 = vcmp.eq.f32.partialorder %v751_v48, 8.507059e+37 }
 0x3ee   : > { %v1259_v61 = vpop.eup %1258  ;;  %v739_v6 = vor.u32 1.1754944e-38, %v738_v29  ;;  %vm737_vm5 = vcmp.eq.f32.partialorder %v736_v34, 8.507059e+37 }
 0x3ef   : > { %994 = vmatpush.msra.mxu2 %v972_v23  ;;  %v765_v0 = vsel %vm764_vm13, %v1255_v55, %v761_v47  ;;  %v746_v30 = vadd.f32 %v1257_v41, %v745_v36  ;;  %v728_v17 = vmul.f32 %v1259_v61, %v1967_v40  ;;  %vm733_vm1 = vweird.f32 %v1259_v61 }
 0x3f0   : > { %v770_v33 = vsel %vm767_vm10, %v769_v56, %v765_v0  ;;  %vm734_vm4 = vmor %vm732_vm3, %vm733_vm1 }
 0x3f1   : > { %995 = vmatpush.msra.mxu2 %v971_v60  ;;  %v750_v26 = vsel %vm749_vm15, %v1257_v41, %v746_v30  ;;  %v729_v22 = vsub.f32 1.0, %v728_v17  ;;  %v969_v37 = vmul.f32 %v770_v33, %v1387_v5  ;;  %v1320_v5 = vmov 1.0  }
 0x3f2   : > { %v755_v25 = vsel %vm752_vm0, %v754_v21, %v750_v26 }
 0x3f3   : > { %996 = vmatpush.msra.mxu2 %v970_v24  ;;  %v730_v8 = vmul.f32 %v1259_v61, %v729_v22  ;;  %v968_v15 = vmul.f32 %v755_v25, %v1382_v4 }
 0x3f5   : > { %997 = vmatpush.msra.mxu2 %v969_v37  ;;  %v731_v12 = vadd.f32 %v1259_v61, %v730_v8 }
 0x3f7   : > { %998 = vmatpush.msra.mxu2 %v968_v15  ;;  %v735_v13 = vsel %vm734_vm4, %v1259_v61, %v731_v12 }
 0x3f8   : > { %v740_v59 = vsel %vm737_vm5, %v739_v6, %v735_v13 }
 0x3f9   : > { %v967_v31 = vmul.f32 %v740_v59, %v1377_v3 }
 0x3fb   : > { %999 = vmatpush.msra.mxu2 %v967_v31 }
 0x3fc   : > { %1137 = vmatmul.msk.f32.vlgmr.msra.gmra.mxu2 %vm249_vm2, %v1320_v5 }
 0x47f   : > { %v1001_v39 = vpop.f32.mrf.mxu2 }
 0x480   : > { %v1004_v4 = vadd.f32 %v1001_v39, %v983_v53 }
 0x482   : > { %1005 = vst.msk [vmem:[#allocation5] sm:$0xff] %vm336_vm9, %v1004_v4 }
 0x483 PF: > { %p1155_p7 = scmp.eq.s32.totalorder %s1093_s18, 1  ;;  %s1014_s5 = sshll.u32 %s2051_s4, 4  ;;  %s1015_s5 = int_to_ptr.hbm [resolvable:$true] %s1014_s5 }
 0x484   : > { %s1321_s6 = smov [#allocation5]  }
 0x485   : > { %s1012_s7 = sshll.u32 %s1321_s6, 4  ;;  %s1013_s7 = int_to_ptr.vmem [resolvable:$true] %s1012_s7 }
 0x486   : > { %1152 = dma.vmem_to_hbm [thread:$0]  (%p1155_p7), %s1013_s7, 128, %s1015_s5, [#allocation6]  }
 0x487   : > { %1301 = dma.done.wait (%p1155_p7), [#allocation6], 128  }
 0x488   : > { %1303 = vsyncadd (%p1155_p7), [#allocation6], 4294967168 }
 0x489 PF: > { %s15_s17 = sadd.s32 1, %s1314_s17   ;;  %s2102_s15 = smov %s1310_s16 }
 0x48a   : > { %p12_p8 = scmp.ge.s32.totalorder %s15_s17, 4   ;;  %s2103_s16 = smov %s2105_s19 }
 0x48c   :  { %14 = sbr.rel (!%p12_p8) target bundleno = 2 (0x2), region = 85 }
 0x491   :  { %1028 = vsyncpa [#allocation6], 1 }
 0x492   :  { %1030 = vsyncpa [#allocation6 + $0x1], 1 }

</bundles_post_ra>
